<compile_context>
chip_gen: v5e
topology: v5e:2x2
jax: 0.10.0
libtpu: 0.0.40
codegen_flags: <defaults>
</compile_context>

<pallas_src>
import functools

import jax
import jax.numpy as jnp
from jax.experimental import pallas as pl
from jax.experimental.pallas import tpu as pltpu

A_PAD = 8        # padded action lanes (>= a_dim); keeps output writeback small
H_PAD = 128      # lane-dense padded hidden dim (weight-side zero padding only)
NEG_BIG = -1e30  # bias for padded action lanes -> exp underflows to exactly 0


def pi_net_kernel(x_ref, w0_ref, b0_ref, w1_ref, b1_ref, out_ref):
    # x : (TB, s_dim)      batch tile of raw states
    # w0: (s_dim, H_PAD)   fc0 weight (transposed, zero-padded hidden cols)
    # b0: (1, H_PAD)       fc0 bias   (zero-padded)
    # w1: (H_PAD, A_PAD)   fc1 weight (zero-padded rows/cols)
    # b1: (1, A_PAD)       fc1 bias; padded action lanes hold NEG_BIG
    x = x_ref[...]

    # fc0 + bias (VPU broadcast add) + ReLU.
    h = jnp.dot(x, w0_ref[...], preferred_element_type=jnp.float32)
    h = jnp.maximum(h + b0_ref[...], 0.0)                     # (TB, H_PAD)

    # fc1 + bias -> padded logits.  Padded hidden units are exactly 0 and the
    # corresponding w1 rows are 0, so they contribute nothing.
    logits = jnp.dot(h, w1_ref[...], preferred_element_type=jnp.float32)
    logits = logits + b1_ref[...]                             # (TB, A_PAD)

    # Numerically stable softmax over the (padded) action axis; padded lanes
    # have logit ~ -1e30 so exp underflows to exactly 0 in f32.
    m = jnp.max(logits, axis=-1, keepdims=True)
    e = jnp.exp(logits - m)
    out_ref[...] = e / jnp.sum(e, axis=-1, keepdims=True)     # exact normalize


def pack_params(w0, b0, w1, b1):
    """One-time packing of parameters into padded, kernel-ready layouts.
    Call once per parameter update and reuse across forward calls."""
    s_dim, h_dim = w0.shape
    a_dim = w1.shape[1]
    assert h_dim <= H_PAD and a_dim <= A_PAD

    w0p = jnp.zeros((s_dim, H_PAD), jnp.float32)
    w0p = w0p.at[:, :h_dim].set(jnp.asarray(w0, jnp.float32))
    b0p = jnp.zeros((1, H_PAD), jnp.float32)
    b0p = b0p.at[0, :h_dim].set(jnp.asarray(b0, jnp.float32))

    w1p = jnp.zeros((H_PAD, A_PAD), jnp.float32)
    w1p = w1p.at[:h_dim, :a_dim].set(jnp.asarray(w1, jnp.float32))
    b1p = jnp.full((1, A_PAD), NEG_BIG, jnp.float32)
    b1p = b1p.at[0, :a_dim].set(jnp.asarray(b1, jnp.float32))
    return w0p, b0p, w1p, b1p


def _round_up(x, m):
    return (x + m - 1) // m * m


@functools.partial(jax.jit, static_argnames=("tile_b", "a_dim"))
def _pi_net_pallas(states, w0p, b0p, w1p, b1p, *, tile_b, a_dim):
    B, s_dim = states.shape
    b_pad = tile_b * pl.cdiv(B, tile_b)
    if b_pad != B:  # pad batch rows only when needed (shapes are static)
        states = jnp.pad(states, ((0, b_pad - B), (0, 0)))

    out_padded = pl.pallas_call(
        pi_net_kernel,
        out_shape=jax.ShapeDtypeStruct((b_pad, A_PAD), jnp.float32),
        grid=(b_pad // tile_b,),
        in_specs=[
            pl.BlockSpec((tile_b, s_dim), lambda i: (i, 0)),   # batch tiles
            pl.BlockSpec((s_dim, H_PAD), lambda i: (0, 0)),    # resident
            pl.BlockSpec((1, H_PAD), lambda i: (0, 0)),        # resident
            pl.BlockSpec((H_PAD, A_PAD), lambda i: (0, 0)),    # resident
            pl.BlockSpec((1, A_PAD), lambda i: (0, 0)),        # resident
        ],
        out_specs=pl.BlockSpec((tile_b, A_PAD), lambda i: (i, 0)),
        compiler_params=pltpu.CompilerParams(
            dimension_semantics=("parallel",)),
    )(states, w0p, b0p, w1p, b1p)

    return out_padded[:B, :a_dim]


def pi_net_forward_batched(states, packed_params, a_dim):
    """states: (B, s_dim). Returns (B, a_dim) action probabilities."""
    states = jnp.asarray(states, jnp.float32)
    B = states.shape[0]
    # Large tiles amortize the ~0.35us/step fixed cost, but keep >= 2 grid
    # steps whenever possible so v7x's two TensorCores both get work.
    tile_b = min(2048, max(8, _round_up(pl.cdiv(B, 2), 8)))
    return _pi_net_pallas(states, *packed_params, tile_b=tile_b, a_dim=a_dim)


def pi_net_forward(state, w0, b0, w1, b1):
    """Single-state path matching the original PyTorch usage:
    state (s_dim,) -> softmax(dim=0) probabilities (a_dim,).
    B=1 is ~300 FLOPs; a Pallas launch is pure overhead, so use plain XLA."""
    state = jnp.asarray(state, jnp.float32)
    h = jnp.maximum(state @ jnp.asarray(w0, jnp.float32)
                    + jnp.asarray(b0, jnp.float32), 0.0)
    return jax.nn.softmax(h @ jnp.asarray(w1, jnp.float32)
                          + jnp.asarray(b1, jnp.float32), axis=0)


def init_params(key, s_dim, h_dim, a_dim):
    """PyTorch-Linear-style init; weights stored transposed: (in, out)."""
    k0, k1, k2, k3 = jax.random.split(key, 4)
    bound0 = 1.0 / jnp.sqrt(s_dim)
    bound1 = 1.0 / jnp.sqrt(h_dim)
    w0 = jax.random.uniform(k0, (s_dim, h_dim), jnp.float32, -bound0, bound0)
    b0 = jax.random.uniform(k1, (h_dim,), jnp.float32, -bound0, bound0)
    w1 = jax.random.uniform(k2, (h_dim, a_dim), jnp.float32, -bound1, bound1)
    b1 = jax.random.uniform(k3, (a_dim,), jnp.float32, -bound1, bound1)
    return w0, b0, w1, b1


if __name__ == "__main__":
    # CartPole-like sizes: state dim 4, hidden 32, 2 actions.
    s_dim, h_dim, a_dim = 4, 32, 2

    key = jax.random.PRNGKey(0)
    pkey, skey, skey1 = jax.random.split(key, 3)
    w0, b0, w1, b1 = init_params(pkey, s_dim, h_dim, a_dim)
    packed = pack_params(w0, b0, w1, b1)   # hoisted: reuse across RL steps

    # Batched forward (batch not a multiple of the tile -> exercises padding;
    # the tile_b heuristic yields a 2-step grid here).
    B = 200
    states = jax.random.normal(skey, (B, s_dim), jnp.float32)
    probs = jax.block_until_ready(
        pi_net_forward_batched(states, packed, a_dim))
    assert probs.shape == (B, a_dim)

    # Plain-JAX reference.
    h_ref = jnp.maximum(states @ w0 + b0, 0.0)
    ref = jax.nn.softmax(h_ref @ w1 + b1, axis=-1)
    assert jnp.allclose(probs, ref, atol=2e-3, rtol=2e-3), (probs[:4], ref[:4])
    assert jnp.allclose(jnp.sum(probs, axis=-1), 1.0, atol=1e-5)

    # Single-state path (original module's softmax(dim=0) on a 1-D output).
    state1 = jax.random.normal(skey1, (s_dim,), jnp.float32)
    p1 = jax.block_until_ready(pi_net_forward(state1, w0, b0, w1, b1))
    ref1 = jax.nn.softmax(jnp.maximum(state1 @ w0 + b0, 0.0) @ w1 + b1, axis=0)
    assert p1.shape == (a_dim,)
    assert jnp.allclose(p1, ref1, atol=2e-3, rtol=2e-3), (p1, ref1)

    print("KERNEL_OK")
</pallas_src>

<mosaic_0001>
module attributes {stable_mosaic.version = 11 : i64} {
  func.func @pi_net_kernel(%arg0: i32, %arg1: memref<104x4xf32, #tpu.memory_space<vmem>>, %arg2: memref<4x128xf32, #tpu.memory_space<vmem>>, %arg3: memref<1x128xf32, #tpu.memory_space<vmem>>, %arg4: memref<128x8xf32, #tpu.memory_space<vmem>>, %arg5: memref<1x8xf32, #tpu.memory_space<vmem>>, %arg6: memref<104x8xf32, #tpu.memory_space<vmem>>) attributes {dimension_semantics = [#tpu.dimension_semantics<parallel>], iteration_bounds = array<i64: 2>, scalar_prefetch = 0 : i64, scratch_operands = 0 : i64, tpu.core_type = #tpu.core_type<tc>, window_params = [{transform_indices = @transform_0, window_bounds = array<i64: 104, 4>}, {pipeline_mode = #tpu.pipeline_mode<synchronous>, transform_indices = @transform_1, window_bounds = array<i64: 4, 128>}, {pipeline_mode = #tpu.pipeline_mode<synchronous>, transform_indices = @transform_2, window_bounds = array<i64: 1, 128>}, {pipeline_mode = #tpu.pipeline_mode<synchronous>, transform_indices = @transform_3, window_bounds = array<i64: 128, 8>}, {pipeline_mode = #tpu.pipeline_mode<synchronous>, transform_indices = @transform_4, window_bounds = array<i64: 1, 8>}, {transform_indices = @transform_5, window_bounds = array<i64: 104, 8>}]} {
    %c0 = arith.constant 0 : index
    %c0_0 = arith.constant 0 : index
    %0 = vector.load %arg1[%c0, %c0_0] : memref<104x4xf32, #tpu.memory_space<vmem>>, vector<104x4xf32>
    %c0_1 = arith.constant 0 : index
    %c0_2 = arith.constant 0 : index
    %1 = vector.load %arg2[%c0_1, %c0_2] : memref<4x128xf32, #tpu.memory_space<vmem>>, vector<4x128xf32>
    %cst = arith.constant dense<0.000000e+00> : vector<104x128xf32>
    %2 = tpu.matmul %0, %1, %cst {dimension_numbers = #tpu.dot_dimension_numbers<[1], [0], [0], [1], [0, 0, 1, 1], [], []>} : vector<104x4xf32>, vector<4x128xf32>, vector<104x128xf32> -> vector<104x128xf32>
    %c0_3 = arith.constant 0 : index
    %c0_4 = arith.constant 0 : index
    %3 = vector.load %arg3[%c0_3, %c0_4] : memref<1x128xf32, #tpu.memory_space<vmem>>, vector<1x128xf32>
    %4 = vector.broadcast %3 : vector<1x128xf32> to vector<104x128xf32>
    %5 = arith.addf %2, %4 : vector<104x128xf32>
    %cst_5 = arith.constant 0.000000e+00 : f32
    %6 = vector.broadcast %cst_5 : f32 to vector<104x128xf32>
    %7 = arith.maximumf %5, %6 : vector<104x128xf32>
    %c0_6 = arith.constant 0 : index
    %c0_7 = arith.constant 0 : index
    %8 = vector.load %arg4[%c0_6, %c0_7] : memref<128x8xf32, #tpu.memory_space<vmem>>, vector<128x8xf32>
    %cst_8 = arith.constant dense<0.000000e+00> : vector<104x8xf32>
    %9 = tpu.matmul %7, %8, %cst_8 {dimension_numbers = #tpu.dot_dimension_numbers<[1], [0], [0], [1], [0, 0, 1, 1], [], []>} : vector<104x128xf32>, vector<128x8xf32>, vector<104x8xf32> -> vector<104x8xf32>
    %c0_9 = arith.constant 0 : index
    %c0_10 = arith.constant 0 : index
    %10 = vector.load %arg5[%c0_9, %c0_10] : memref<1x8xf32, #tpu.memory_space<vmem>>, vector<1x8xf32>
    %11 = vector.broadcast %10 : vector<1x8xf32> to vector<104x8xf32>
    %12 = arith.addf %9, %11 : vector<104x8xf32>
    %cst_11 = arith.constant dense<0xFF800000> : vector<104xf32>
    %13 = vector.multi_reduction <maximumf>, %12, %cst_11 [1] : vector<104x8xf32> to vector<104xf32>
    %14 = vector.shape_cast %13 : vector<104xf32> to vector<104x1xf32>
    %15 = vector.broadcast %14 : vector<104x1xf32> to vector<104x8xf32>
    %16 = arith.subf %12, %15 : vector<104x8xf32>
    %17 = math.exp %16 : vector<104x8xf32>
    %cst_12 = arith.constant dense<0.000000e+00> : vector<104xf32>
    %18 = vector.multi_reduction <add>, %17, %cst_12 [1] : vector<104x8xf32> to vector<104xf32>
    %19 = vector.shape_cast %18 : vector<104xf32> to vector<104x1xf32>
    %20 = vector.broadcast %19 : vector<104x1xf32> to vector<104x8xf32>
    %21 = arith.divf %17, %20 : vector<104x8xf32>
    %c0_13 = arith.constant 0 : index
    %c0_14 = arith.constant 0 : index
    %22 = vector.load %arg6[%c0_13, %c0_14] : memref<104x8xf32, #tpu.memory_space<vmem>>, vector<104x8xf32>
    tpu.vector_store %arg6[%c0_13, %c0_14], %21 {strides = array<i32>} : memref<104x8xf32, #tpu.memory_space<vmem>>, vector<104x8xf32>,
    return
  }
  func.func @transform_0(%arg0: i32) -> (i32, i32) {
    %c0_i32 = arith.constant 0 : i32
    %c0_i32_0 = arith.constant 0 : i32
    return %arg0, %c0_i32 : i32, i32
  }
  func.func @transform_1(%arg0: i32) -> (i32, i32) {
    %c0_i32 = arith.constant 0 : i32
    %c0_i32_0 = arith.constant 0 : i32
    %c0_i32_1 = arith.constant 0 : i32
    return %c0_i32, %c0_i32_0 : i32, i32
  }
  func.func @transform_2(%arg0: i32) -> (i32, i32) {
    %c0_i32 = arith.constant 0 : i32
    %c0_i32_0 = arith.constant 0 : i32
    %c0_i32_1 = arith.constant 0 : i32
    return %c0_i32, %c0_i32_0 : i32, i32
  }
  func.func @transform_3(%arg0: i32) -> (i32, i32) {
    %c0_i32 = arith.constant 0 : i32
    %c0_i32_0 = arith.constant 0 : i32
    %c0_i32_1 = arith.constant 0 : i32
    return %c0_i32, %c0_i32_0 : i32, i32
  }
  func.func @transform_4(%arg0: i32) -> (i32, i32) {
    %c0_i32 = arith.constant 0 : i32
    %c0_i32_0 = arith.constant 0 : i32
    %c0_i32_1 = arith.constant 0 : i32
    return %c0_i32, %c0_i32_0 : i32, i32
  }
  func.func @transform_5(%arg0: i32) -> (i32, i32) {
    %c0_i32 = arith.constant 0 : i32
    %c0_i32_0 = arith.constant 0 : i32
    return %arg0, %c0_i32 : i32, i32
  }
}

</mosaic_0001>

<bundles_post_ra>
// kernel: _pi_net_pallas.1
= control target key start
LH: loop header
LB: loop body
LE: loop exit
PB: predicated region body
PF: predicated region fallthrough
CT: control target
= control target key end

     0   :  { %s973_s18 = smov 0   ;;  %s1231_s0 = inlined_call_operand.vmem [shape: f32[208,4], index: 0, kind: input, shape index: {}]   ;;  %s1232_s1 = inlined_call_operand.vmem [shape: f32[4,128], index: 1, kind: input, shape index: {}]   ;;  %s1233_s2 = inlined_call_operand.vmem [shape: f32[1,128], index: 2, kind: input, shape index: {}]   ;;  %s1234_s3 = inlined_call_operand.vmem [shape: f32[128,8], index: 3, kind: input, shape index: {}]   ;;  %s1235_s4 = inlined_call_operand.vmem [shape: f32[1,8], index: 4, kind: input, shape index: {}]   ;;  %s1236_s5 = inlined_call_operand.vmem [shape: f32[208,8], index: 5, kind: output, shape index: {}]  }
   0x1 LB: > { %s817_s19 = sadd.s32 4294967295, %s941_s18   ;;  %p821_p0 = scmp.ge.s32.totalorder %s941_s18, 1  ;;  %s941_s18 = sphi %s973_s18, %s15_s18  }
   0x2   : > { %p188_p1 = scmp.lt.s32.totalorder %s941_s18, 3 }
   0x4   : > { %p189_p2 = pnand %p821_p0, %p188_p1 }
   0x5   : > { %s216_s22 = smul.u32 (!%p189_p2), 13, %s817_s19 }
   0x6   : > { %192 = sbr.rel (%p189_p2) target bundleno = 625 (0x271), region = 40 }
   0x7   : > { %p217_p3 = scmp.lt.s32.totalorder (!%p189_p2), %s216_s22, 25 }
   0xb   : > { %v241_v0 = vld [vmem:[%s1232_s1] sm:$0xf]  ;;  %vm286_vm0 = vcmask 1043456   ;;  %s1238_s22 = smov (!%p217_p3, %s216_s22), 25  ;;  %vm246_vm1 = vcmask 31744   ;;  %v374_v9 = vld [vmem:[%s1234_s3 + $0x78] sm:$0xff] }
   0xc   : > { %824 = vmatpush.msk.msra.mxu0 %vm286_vm0, %v241_v0  ;;  %840 = vmatpush.msk.msra.mxu3 %vm286_vm0, %v241_v0  ;;  %s822_s23 = sshll.u32 %s1238_s22, 3  ;;  %v373_v10 = vld [vmem:[%s1234_s3 + $0x70] sm:$0xff]  ;;  %v372_v11 = vld [vmem:[%s1234_s3 + $0x68] sm:$0xff]  ;;  %v371_v12 = vld [vmem:[%s1234_s3 + $0x60] sm:$0xff]  ;;  %vm435_vm2 = vcmask 64512  }
   0xd   : > { %s992_s26 = scalar_lea.vmem %s1231_s0, %s822_s23  ;;  %379 = vmatpush.msra.mxu1 %v374_v9  ;;  %841 = vmatpush.msra.mxu2 %v374_v9  ;;  %v370_v15 = vld [vmem:[%s1234_s3 + $0x58] sm:$0xff]  ;;  %v369_v16 = vld [vmem:[%s1234_s3 + $0x50] sm:$0xff]  ;;  %v368_v17 = vld [vmem:[%s1234_s3 + $0x48] sm:$0xff]  ;;  %s1180_s19 = scalar_lea.vmem %s1236_s5, %s822_s23 }
   0xe   : > { %v228_v1 = vld [vmem:[%s992_s26] sm:$0xff]  ;;  %v229_v2 = vld [vmem:[%s992_s26 + $0x8] sm:$0xff]  ;;  %v230_v3 = vld [vmem:[%s992_s26 + $0x10] sm:$0xff]  ;;  %842 = vmatpush.msrb.mxu3 %v374_v9 }
   0xf   : > { %825 = vmatmul.msk.f32.vlgmr.msra.gmra.mxu0 %vm246_vm1, %v228_v1  ;;  %v237_v4 = vld [vmem:[%s992_s26 + $0x48] sm:$0xff]  ;;  %v231_v5 = vld [vmem:[%s992_s26 + $0x18] sm:$0xff]  ;;  %v238_v6 = vld [vmem:[%s992_s26 + $0x50] sm:$0xff]  ;;  %380 = vmatpush.msra.mxu1 %v373_v10 }
  0x10   : > { %834 = vmatmul.msk.f32.vlgmr.msra.gmra.mxu3 %vm246_vm1, %v237_v4  ;;  %v232_v7 = vld [vmem:[%s992_s26 + $0x20] sm:$0xff]  ;;  %v239_v8 = vld [vmem:[%s992_s26 + $0x58] sm:$0xff]  ;;  %843 = vmatpush.msra.mxu2 %v373_v10  ;;  %v233_v13 = vld [vmem:[%s992_s26 + $0x28] sm:$0xff] }
  0x11   : > { %844 = vmatpush.msrb.mxu3 %v373_v10  ;;  %381 = vmatpush.msra.mxu1 %v372_v11  ;;  %v240_v14 = vld [vmem:[%s992_s26 + $0x60] sm:$0xff]  ;;  %v234_v19 = vld [vmem:[%s992_s26 + $0x30] sm:$0xff]  ;;  %v366_v20 = vld [vmem:[%s1234_s3 + $0x38] sm:$0xff] }
  0x12   : > { %845 = vmatpush.msra.mxu2 %v372_v11  ;;  %v367_v18 = vld [vmem:[%s1234_s3 + $0x40] sm:$0xff]  ;;  %v365_v21 = vld [vmem:[%s1234_s3 + $0x30] sm:$0xff]  ;;  %v364_v22 = vld [vmem:[%s1234_s3 + $0x28] sm:$0xff] }
  0x13   : > { %846 = vmatpush.msrb.mxu3 %v372_v11  ;;  %382 = vmatpush.msra.mxu1 %v371_v12  ;;  %v363_v23 = vld [vmem:[%s1234_s3 + $0x20] sm:$0xff]  ;;  %v235_v24 = vld [vmem:[%s992_s26 + $0x38] sm:$0xff]  ;;  %v361_v27 = vld [vmem:[%s1234_s3 + $0x10] sm:$0xff] }
  0x14   : > { %847 = vmatpush.msra.mxu2 %v371_v12  ;;  %v362_v25 = vld [vmem:[%s1234_s3 + $0x18] sm:$0xff]  ;;  %v236_v26 = vld [vmem:[%s992_s26 + $0x40] sm:$0xff]  ;;  %v360_v28 = vld [vmem:[%s1234_s3 + $0x8] sm:$0xff] }
  0x15   : > { %383 = vmatpush.msra.mxu1 %v370_v15  ;;  %848 = vmatpush.msrb.mxu3 %v371_v12  ;;  %v359_v29 = vld [vmem:[%s1234_s3] sm:$0xff] }
  0x16   : > { %849 = vmatpush.msra.mxu2 %v370_v15  ;;  %v881_v30 = vld [vmem:[%s1233_s2] ss:$0 sm:$0xff] }
  0x17   : > { %826 = vmatmul.msk.f32.gmra.mxu0 %vm246_vm1, %v229_v2  ;;  %384 = vmatpush.msra.mxu1 %v369_v16 }
  0x18   : > { %835 = vmatmul.msk.f32.gmra.mxu3 %vm246_vm1, %v238_v6  ;;  %851 = vmatpush.msra.mxu2 %v369_v16  ;;  %v882_v6 = vld [vmem:[%s1235_s4] ss:$0 sm:$0xff] }
  0x19   : > { %850 = vmatpush.msrb.mxu3 %v370_v15  ;;  %385 = vmatpush.msra.mxu1 %v368_v17 }
  0x1a   : > { %853 = vmatpush.msra.mxu2 %v368_v17 }
  0x1b   : > { %852 = vmatpush.msrb.mxu3 %v369_v16  ;;  %386 = vmatpush.msra.mxu1 %v367_v18 }
  0x1c   : > { %855 = vmatpush.msra.mxu2 %v367_v18 }
  0x1d   : > { %387 = vmatpush.msra.mxu1 %v366_v20  ;;  %854 = vmatpush.msrb.mxu3 %v368_v17 }
  0x1e   : > { %857 = vmatpush.msra.mxu2 %v366_v20 }
  0x1f   : > { %827 = vmatmul.msk.f32.gmra.mxu0 %vm246_vm1, %v230_v3  ;;  %388 = vmatpush.msra.mxu1 %v365_v21 }
  0x20   : > { %836 = vmatmul.msk.f32.gmra.mxu3 %vm246_vm1, %v239_v8  ;;  %859 = vmatpush.msra.mxu2 %v365_v21 }
  0x21   : > { %856 = vmatpush.msrb.mxu3 %v367_v18  ;;  %389 = vmatpush.msra.mxu1 %v364_v22 }
  0x22   : > { %861 = vmatpush.msra.mxu2 %v364_v22 }
  0x23   : > { %858 = vmatpush.msrb.mxu3 %v366_v20  ;;  %390 = vmatpush.msra.mxu1 %v363_v23 }
  0x24   : > { %863 = vmatpush.msra.mxu2 %v363_v23 }
  0x25   : > { %860 = vmatpush.msrb.mxu3 %v365_v21  ;;  %391 = vmatpush.msra.mxu1 %v362_v25 }
  0x26   : > { %865 = vmatpush.msra.mxu2 %v362_v25 }
  0x27   : > { %828 = vmatmul.msk.f32.gmra.mxu0 %vm246_vm1, %v231_v5  ;;  %862 = vmatpush.msrb.mxu3 %v364_v22 }
  0x28   : > { %837 = vmatmul.msk.f32.gmra.mxu3 %vm246_vm1, %v240_v14  ;;  %392 = vmatpush.msra.mxu1 %v361_v27 }
  0x29   : > { %864 = vmatpush.msrb.mxu3 %v363_v23  ;;  %867 = vmatpush.msra.mxu2 %v361_v27 }
  0x2a   : > { %393 = vmatpush.msra.mxu1 %v360_v28 }
  0x2b   : > { %866 = vmatpush.msrb.mxu3 %v362_v25  ;;  %869 = vmatpush.msra.mxu2 %v360_v28 }
  0x2c   : > { %394 = vmatpush.msra.mxu1 %v359_v29 }
  0x2d   : > { %868 = vmatpush.msrb.mxu3 %v361_v27  ;;  %871 = vmatpush.msra.mxu2 %v359_v29 }
  0x2f   : > { %829 = vmatmul.msk.f32.gmra.mxu0 %vm246_vm1, %v232_v7  ;;  %870 = vmatpush.msrb.mxu3 %v360_v28 }
  0x31   : > { %872 = vmatpush.msrb.mxu3 %v359_v29 }
  0x37   : > { %830 = vmatmul.msk.f32.gmra.mxu0 %vm246_vm1, %v233_v13 }
  0x3f   : > { %831 = vmatmul.msk.f32.gmra.mxu0 %vm246_vm1, %v234_v19 }
  0x47   : > { %832 = vmatmul.msk.f32.gmra.mxu0 %vm246_vm1, %v235_v24 }
  0x4f   : > { %833 = vmatmul.msk.f32.gmra.mxu0 %vm246_vm1, %v236_v26 }
  0x8c   : > { %v307_v31 = vpop.f32.mrf.mxu0 }
  0x8d   : > { %v308_v32 = vadd.f32 %v881_v30, %v307_v31 }
  0x8f   : > { %v346_v33 = vmax.f32 %v308_v32, 0.0 }
  0x91   : > { %395 = vmatmul.f32.vlgmr.msra.gmra.mxu1 %v346_v33 }
  0x93   : > { %v334_v41 = vpop.f32.mrf.mxu3 }
  0x94   : > { %v310_v34 = vpop.f32.mrf.mxu0  ;;  %v335_v4 = vadd.f32 %v881_v30, %v334_v41 }
  0x95   : > { %v311_v35 = vadd.f32 %v881_v30, %v310_v34 }
  0x96   : > { %v355_v5 = vmax.f32 %v335_v4, 0.0 }
  0x97   : > { %v347_v36 = vmax.f32 %v311_v35, 0.0 }
  0x99   : > { %398 = vmatmul.f32.gmra.mxu1 %v347_v36 }
  0x9b   : > { %v337_v45 = vpop.f32.mrf.mxu3 }
  0x9c   : > { %v313_v37 = vpop.f32.mrf.mxu0  ;;  %v338_v47 = vadd.f32 %v881_v30, %v337_v45 }
  0x9d   : > { %v314_v38 = vadd.f32 %v881_v30, %v313_v37 }
  0x9e   : > { %v356_v49 = vmax.f32 %v338_v47, 0.0 }
  0x9f   : > { %v348_v39 = vmax.f32 %v314_v38, 0.0 }
  0xa0   : > { %425 = vmatmul.f32.vlgmr.msrb.gmra.mxu3 %v356_v49 }
  0xa1   : > { %401 = vmatmul.f32.gmra.mxu1 %v348_v39 }
  0xa3   : > { %v340_v51 = vpop.f32.mrf.mxu3 }
  0xa4   : > { %v316_v40 = vpop.f32.mrf.mxu0  ;;  %v341_v53 = vadd.f32 %v881_v30, %v340_v51 }
  0xa5   : > { %v317_v42 = vadd.f32 %v881_v30, %v316_v40 }
  0xa6   : > { %v357_v55 = vmax.f32 %v341_v53, 0.0 }
  0xa7   : > { %v349_v43 = vmax.f32 %v317_v42, 0.0 }
  0xa8   : > { %428 = vmatmul.f32.gmra.mxu3 %v357_v55 }
  0xa9   : > { %404 = vmatmul.f32.gmra.mxu1 %v349_v43 }
  0xab   : > { %v343_v57 = vpop.f32.mrf.mxu3 }
  0xac   : > { %v319_v44 = vpop.f32.mrf.mxu0  ;;  %v344_v59 = vadd.f32 %v881_v30, %v343_v57 }
  0xad   : > { %v320_v46 = vadd.f32 %v881_v30, %v319_v44 }
  0xae   : > { %v358_v61 = vmax.f32 %v344_v59, 0.0 }
  0xaf   : > { %v350_v48 = vmax.f32 %v320_v46, 0.0 }
  0xb0   : > { %431 = vmatmul.f32.gmra.mxu3 %v358_v61 }
  0xb1   : > { %407 = vmatmul.f32.gmra.mxu1 %v350_v48 }
  0xb4   : > { %v322_v50 = vpop.f32.mrf.mxu0 }
  0xb5   : > { %v323_v52 = vadd.f32 %v881_v30, %v322_v50 }
  0xb7   : > { %v351_v54 = vmax.f32 %v323_v52, 0.0 }
  0xb9   : > { %410 = vmatmul.f32.vlgmr.msra.gmra.mxu2 %v351_v54 }
  0xbc   : > { %v325_v56 = vpop.f32.mrf.mxu0 }
  0xbd   : > { %v326_v58 = vadd.f32 %v881_v30, %v325_v56 }
  0xbf   : > { %v352_v60 = vmax.f32 %v326_v58, 0.0 }
  0xc1   : > { %413 = vmatmul.f32.gmra.mxu2 %v352_v60 }
  0xc4   : > { %v328_v62 = vpop.f32.mrf.mxu0 }
  0xc5   : > { %v329_v63 = vadd.f32 %v881_v30, %v328_v62 }
  0xc7   : > { %v353_v0 = vmax.f32 %v329_v63, 0.0 }
  0xc9   : > { %416 = vmatmul.f32.gmra.mxu2 %v353_v0 }
  0xcc   : > { %v331_v1 = vpop.f32.mrf.mxu0 }
  0xcd   : > { %v332_v2 = vadd.f32 %v881_v30, %v331_v1 }
  0xcf   : > { %v354_v3 = vmax.f32 %v332_v2, 0.0 }
  0xd1   : > { %419 = vmatmul.f32.gmra.mxu2 %v354_v3 }
  0xd9   : > { %422 = vmatmul.f32.gmra.mxu2 %v355_v5 }
 0x10e   : > { %v396_v7 = vpop.f32.mrf.mxu1 }
 0x10f   : > { %v397_v8 = vadd.f32 %v882_v6, %v396_v7 }
 0x111   : > { %v436_v9 = vsel %vm435_vm2, %v397_v8, -inf }
 0x112   : > { %437 = vmax.xlane.f32.xlu0 %v436_v9 }
 0x116   : > { %v399_v10 = vpop.f32.mrf.mxu1 }
 0x117   : > { %v400_v11 = vadd.f32 %v882_v6, %v399_v10 }
 0x119   : > { %v439_v12 = vsel %vm435_vm2, %v400_v11, -inf }
 0x11a   : > { %440 = vmax.xlane.f32.xlu0 %v439_v12 }
 0x11e   : > { %v402_v13 = vpop.f32.mrf.mxu1 }
 0x11f   : > { %v403_v14 = vadd.f32 %v882_v6, %v402_v13 }
 0x121   : > { %v442_v15 = vsel %vm435_vm2, %v403_v14, -inf }
 0x122   : > { %443 = vmax.xlane.f32.xlu1 %v442_v15 }
 0x123   : > { %v426_v28 = vpop.f32.mrf.mxu3 }
 0x124   : > { %v1094_v32 = vadd.f32 %v882_v6, %v426_v28 }
 0x126   : > { %v405_v16 = vpop.f32.mrf.mxu1  ;;  %v466_v36 = vsel %vm435_vm2, %v1094_v32, -inf }
 0x127   : > { %v406_v17 = vadd.f32 %v882_v6, %v405_v16 }
 0x129   : > { %v445_v18 = vsel %vm435_vm2, %v406_v17, -inf }
 0x12a   : > { %446 = vmax.xlane.f32.xlu1 %v445_v18 }
 0x12b   : > { %v429_v34 = vpop.f32.mrf.mxu3 }
 0x12c   : > { %v1102_v38 = vadd.f32 %v882_v6, %v429_v34 }
 0x12e   : > { %v408_v19 = vpop.f32.mrf.mxu1  ;;  %v469_v41 = vsel %vm435_vm2, %v1102_v38, -inf }
 0x12f   : > { %v1078_v20 = vadd.f32 %v882_v6, %v408_v19 }
 0x131   : > { %v448_v21 = vsel %vm435_vm2, %v1078_v20, -inf }
 0x132   : > { %449 = vmax.xlane.f32.xlu2 %v448_v21 }
 0x133   : > { %v432_v42 = vpop.f32.mrf.mxu3 }
 0x134   : > { %v1110_v44 = vadd.f32 %v882_v6, %v432_v42 }
 0x136   : > { %v472_v45 = vsel %vm435_vm2, %v1110_v44, -inf }
 0x13c   : > { %v411_v22 = vpop.f32.mrf.mxu2 }
 0x13d   : > { %v1082_v23 = vadd.f32 %v882_v6, %v411_v22 }
 0x13f   : > { %v451_v24 = vsel %vm435_vm2, %v1082_v23, -inf }
 0x140   : > { %452 = vmax.xlane.f32.xlu2 %v451_v24 }
 0x144   : > { %v414_v25 = vpop.f32.mrf.mxu2 }
 0x145   : > { %v1086_v26 = vadd.f32 %v882_v6, %v414_v25 }
 0x147   : > { %v454_v27 = vsel %vm435_vm2, %v1086_v26, -inf }
 0x148   : > { %455 = vmax.xlane.f32.xlu0 %v454_v27 }
 0x14c   : > { %v417_v29 = vpop.f32.mrf.mxu2 }
 0x14d   : > { %v1090_v30 = vadd.f32 %v882_v6, %v417_v29 }
 0x14f   : > { %v457_v31 = vsel %vm435_vm2, %v1090_v30, -inf }
 0x150   : > { %458 = vmax.xlane.f32.xlu1 %v457_v31 }
 0x154   : > { %v420_v33 = vpop.f32.mrf.mxu2 }
 0x155   : > { %v1096_v35 = vadd.f32 %v882_v6, %v420_v33 }
 0x157   : > { %v460_v37 = vsel %vm435_vm2, %v1096_v35, -inf }
 0x158   : > { %461 = vmax.xlane.f32.xlu2 %v460_v37  ;;  %467 = vmax.xlane.f32.xlu1 %v466_v36 }
 0x15c   : > { %v423_v39 = vpop.f32.mrf.mxu2 }
 0x15d   : > { %v1104_v40 = vadd.f32 %v882_v6, %v423_v39 }
 0x15f   : > { %v463_v43 = vsel %vm435_vm2, %v1104_v40, -inf }
 0x160   : > { %470 = vmax.xlane.f32.xlu2 %v469_v41  ;;  %464 = vmax.xlane.f32.xlu0 %v463_v43 }
 0x168   : > { %473 = vmax.xlane.f32.xlu0 %v472_v45 }
 0x185   : > { %v438_v46 = vpop.xlane.xlu0 %437 }
 0x186   : > { %v475_v47 = vsub.f32 %v397_v8, %v438_v46 }
 0x188   : > { %v488_v48 = vmul.f32 1.442695, %v475_v47 }
 0x18a   : > { %883 = vpow2.f32 %v488_v48 }
 0x18d   : > { %v441_v49 = vpop.xlane.xlu0 %440 }
 0x18e   : > { %v476_v50 = vsub.f32 %v400_v11, %v441_v49 }
 0x190   : > { %v1114_v51 = vpop.eup %883  ;;  %v490_v52 = vmul.f32 1.442695, %v476_v50 }
 0x191   : > { %v514_v53 = vsel %vm435_vm2, %v1114_v51, 0.0 }
 0x192   : > { %885 = vpow2.f32 %v490_v52  ;;  %515 = vadd.xlane.f32.xlu1 %v514_v53 }
 0x195   : > { %v444_v54 = vpop.xlane.xlu1 %443 }
 0x196   : > { %v477_v55 = vsub.f32 %v403_v14, %v444_v54 }
 0x198   : > { %v1118_v56 = vpop.eup %885  ;;  %v492_v57 = vmul.f32 1.442695, %v477_v55 }
 0x199   : > { %v517_v58 = vsel %vm435_vm2, %v1118_v56, 0.0 }
 0x19a   : > { %887 = vpow2.f32 %v492_v57  ;;  %518 = vadd.xlane.f32.xlu2 %v517_v58 }
 0x19d   : > { %v447_v59 = vpop.xlane.xlu1 %446 }
 0x19e   : > { %v478_v60 = vsub.f32 %v406_v17, %v447_v59 }
 0x1a0   : > { %v1122_v61 = vpop.eup %887  ;;  %v494_v62 = vmul.f32 1.442695, %v478_v60 }
 0x1a1   : > { %v520_v63 = vsel %vm435_vm2, %v1122_v61, 0.0 }
 0x1a2   : > { %889 = vpow2.f32 %v494_v62  ;;  %521 = vadd.xlane.f32.xlu0 %v520_v63 }
 0x1a5   : > { %v450_v0 = vpop.xlane.xlu2 %449 }
 0x1a6   : > { %v479_v1 = vsub.f32 %v1078_v20, %v450_v0 }
 0x1a8   : > { %v1127_v2 = vpop.eup %889  ;;  %v496_v3 = vmul.f32 1.442695, %v479_v1 }
 0x1a9   : > { %v523_v4 = vsel %vm435_vm2, %v1127_v2, 0.0 }
 0x1aa   : > { %891 = vpow2.f32 %v496_v3  ;;  %524 = vadd.xlane.f32.xlu1 %v523_v4 }
 0x1b0   : > { %v1131_v5 = vpop.eup %891 }
 0x1b1   : > { %v526_v6 = vsel %vm435_vm2, %v1131_v5, 0.0 }
 0x1b2   : > { %527 = vadd.xlane.f32.xlu2 %v526_v6 }
 0x1b3   : > { %v453_v7 = vpop.xlane.xlu2 %452 }
 0x1b4   : > { %v480_v8 = vsub.f32 %v1082_v23, %v453_v7 }
 0x1b6   : > { %v498_v9 = vmul.f32 1.442695, %v480_v8 }
 0x1b8   : > { %893 = vpow2.f32 %v498_v9 }
 0x1bb   : > { %v456_v10 = vpop.xlane.xlu0 %455 }
 0x1bc   : > { %v481_v11 = vsub.f32 %v1086_v26, %v456_v10 }
 0x1be   : > { %v1137_v12 = vpop.eup %893  ;;  %v500_v13 = vmul.f32 1.442695, %v481_v11 }
 0x1bf   : > { %v529_v14 = vsel %vm435_vm2, %v1137_v12, 0.0 }
 0x1c0   : > { %895 = vpow2.f32 %v500_v13  ;;  %530 = vadd.xlane.f32.xlu0 %v529_v14 }
 0x1c3   : > { %v459_v15 = vpop.xlane.xlu1 %458 }
 0x1c4   : > { %v482_v16 = vsub.f32 %v1090_v30, %v459_v15 }
 0x1c6   : > { %v1142_v17 = vpop.eup %895  ;;  %v502_v18 = vmul.f32 1.442695, %v482_v16 }
 0x1c7   : > { %v532_v19 = vsel %vm435_vm2, %v1142_v17, 0.0 }
 0x1c8   : > { %897 = vpow2.f32 %v502_v18  ;;  %533 = vadd.xlane.f32.xlu1 %v532_v19 }
 0x1cb   : > { %v462_v20 = vpop.xlane.xlu2 %461  ;;  %v468_v21 = vpop.xlane.xlu1 %467 }
 0x1cc   : > { %v483_v22 = vsub.f32 %v1096_v35, %v462_v20  ;;  %v485_v23 = vsub.f32 %v1094_v32, %v468_v21 }
 0x1ce   : > { %v1148_v24 = vpop.eup %897  ;;  %v504_v25 = vmul.f32 1.442695, %v483_v22  ;;  %v508_v26 = vmul.f32 1.442695, %v485_v23 }
 0x1cf   : > { %v535_v27 = vsel %vm435_vm2, %v1148_v24, 0.0 }
 0x1d0   : > { %899 = vpow2.f32 %v504_v25  ;;  %536 = vadd.xlane.f32.xlu2 %v535_v27 }
 0x1d1   : > { %901 = vpow2.f32 %v508_v26 }
 0x1d3   : > { %v471_v28 = vpop.xlane.xlu2 %470  ;;  %v465_v29 = vpop.xlane.xlu0 %464 }
 0x1d4   : > { %v486_v30 = vsub.f32 %v1102_v38, %v471_v28  ;;  %v484_v31 = vsub.f32 %v1104_v40, %v465_v29 }
 0x1d6   : > { %v1154_v33 = vpop.eup %899  ;;  %v510_v34 = vmul.f32 1.442695, %v486_v30  ;;  %v506_v32 = vmul.f32 1.442695, %v484_v31 }
 0x1d7   : > { %v1156_v35 = vpop.eup %901  ;;  %v538_v36 = vsel %vm435_vm2, %v1154_v33, 0.0 }
 0x1d8   : > { %903 = vpow2.f32 %v510_v34  ;;  %539 = vadd.xlane.f32.xlu0 %v538_v36  ;;  %v544_v37 = vsel %vm435_vm2, %v1156_v35, 0.0 }
 0x1d9   : > { %905 = vpow2.f32 %v506_v32  ;;  %545 = vadd.xlane.f32.xlu2 %v544_v37 }
 0x1db   : > { %v474_v39 = vpop.xlane.xlu0 %473 }
 0x1dc   : > { %v487_v38 = vsub.f32 %v1110_v44, %v474_v39 }
 0x1de   : > { %v1163_v40 = vpop.eup %903  ;;  %v512_v41 = vmul.f32 1.442695, %v487_v38 }
 0x1df   : > { %v1165_v42 = vpop.eup %905  ;;  %v547_v43 = vsel %vm435_vm2, %v1163_v40, 0.0 }
 0x1e0   : > { %907 = vpow2.f32 %v512_v41  ;;  %548 = vadd.xlane.f32.xlu0 %v547_v43  ;;  %v541_v45 = vsel %vm435_vm2, %v1165_v42, 0.0 }
 0x1e1   : > { %542 = vadd.xlane.f32.xlu1 %v541_v45 }
 0x1e6   : > { %v1171_v46 = vpop.eup %907 }
 0x1e7   : > { %v550_v47 = vsel %vm435_vm2, %v1171_v46, 0.0 }
 0x1e9   : > { %551 = vadd.xlane.f32.xlu1 %v550_v47 }
 0x205   : > { %v516_v44 = vpop.xlane.xlu1 %515 }
 0x206   : > { %909 = vrcp.f32 %v516_v44  ;;  %v564_v53 = vand.u32 2147483648, %v516_v44  ;;  %v562_v55 = vand.u32 2147483647, %v516_v44  ;;  %vm558_vm4 = vweird.f32 %v516_v44 }
 0x208   : > { %v565_v59 = vor.u32 1.1754944e-38, %v564_v53  ;;  %vm563_vm6 = vcmp.eq.f32.partialorder %v562_v55, 8.507059e+37 }
 0x20c   : > { %v910_v48 = vpop.eup %909 }
 0x20d   : > { %v554_v49 = vmul.f32 %v910_v48, %v516_v44  ;;  %v519_v50 = vpop.xlane.xlu2 %518  ;;  %vm559_vm3 = vweird.f32 %v910_v48 }
 0x20e   : > { %911 = vrcp.f32 %v519_v50  ;;  %vm560_vm5 = vmor %vm558_vm4, %vm559_vm3  ;;  %v579_v4 = vand.u32 2147483648, %v519_v50  ;;  %v577_v7 = vand.u32 2147483647, %v519_v50  ;;  %vm573_vm8 = vweird.f32 %v519_v50 }
 0x20f   : > { %v555_v52 = vsub.f32 1.0, %v554_v49 }
 0x210   : > { %v580_v10 = vor.u32 1.1754944e-38, %v579_v4  ;;  %vm578_vm10 = vcmp.eq.f32.partialorder %v577_v7, 8.507059e+37 }
 0x211   : > { %v556_v54 = vmul.f32 %v910_v48, %v555_v52 }
 0x213   : > { %v557_v57 = vadd.f32 %v910_v48, %v556_v54 }
 0x214   : > { %v912_v58 = vpop.eup %911 }
 0x215   : > { %v561_v60 = vsel %vm560_vm5, %v910_v48, %v557_v57  ;;  %v569_v62 = vmul.f32 %v912_v58, %v519_v50  ;;  %v522_v63 = vpop.xlane.xlu0 %521  ;;  %vm574_vm7 = vweird.f32 %v912_v58 }
 0x216   : > { %v566_v0 = vsel %vm563_vm6, %v565_v59, %v561_v60  ;;  %913 = vrcp.f32 %v522_v63  ;;  %vm575_vm9 = vmor %vm573_vm8, %vm574_vm7  ;;  %v594_v18 = vand.u32 2147483648, %v522_v63  ;;  %v592_v20 = vand.u32 2147483647, %v522_v63 }
 0x217   : > { %v567_v1 = vmul.f32 %v1114_v51, %v566_v0  ;;  %v570_v3 = vsub.f32 1.0, %v569_v62  ;;  %vm588_vm12 = vweird.f32 %v522_v63 }
 0x218   : > { %v595_v23 = vor.u32 1.1754944e-38, %v594_v18  ;;  %vm593_vm14 = vcmp.eq.f32.partialorder %v592_v20, 8.507059e+37 }
 0x219   : > { %748 = vst.msk [vmem:[%s1180_s19] sm:$0xff] %vm435_vm2, %v567_v1  ;;  %v571_v6 = vmul.f32 %v912_v58, %v570_v3 }
 0x21b   : > { %v572_v8 = vadd.f32 %v912_v58, %v571_v6 }
 0x21c   : > { %v914_v9 = vpop.eup %913 }
 0x21d   : > { %v576_v11 = vsel %vm575_vm9, %v912_v58, %v572_v8  ;;  %v584_v13 = vmul.f32 %v914_v9, %v522_v63  ;;  %v525_v14 = vpop.xlane.xlu1 %524  ;;  %vm589_vm11 = vweird.f32 %v914_v9 }
 0x21e   : > { %v581_v15 = vsel %vm578_vm10, %v580_v10, %v576_v11  ;;  %915 = vrcp.f32 %v525_v14  ;;  %vm590_vm13 = vmor %vm588_vm12, %vm589_vm11  ;;  %v609_v30 = vand.u32 2147483648, %v525_v14  ;;  %v607_v34 = vand.u32 2147483647, %v525_v14 }
 0x21f   : > { %v582_v51 = vmul.f32 %v1118_v56, %v581_v15  ;;  %v585_v16 = vsub.f32 1.0, %v584_v13  ;;  %vm603_vm0 = vweird.f32 %v525_v14 }
 0x220   : > { %v610_v37 = vor.u32 1.1754944e-38, %v609_v30  ;;  %vm608_vm3 = vcmp.eq.f32.partialorder %v607_v34, 8.507059e+37 }
 0x221   : > { %749 = vst.msk [vmem:[%s1180_s19 + $0x8] sm:$0xff] %vm435_vm2, %v582_v51  ;;  %v586_v19 = vmul.f32 %v914_v9, %v585_v16 }
 0x223   : > { %v587_v21 = vadd.f32 %v914_v9, %v586_v19 }
 0x224   : > { %v916_v22 = vpop.eup %915 }
 0x225   : > { %v591_v25 = vsel %vm590_vm13, %v914_v9, %v587_v21  ;;  %v599_v26 = vmul.f32 %v916_v22, %v525_v14  ;;  %v528_v27 = vpop.xlane.xlu2 %527  ;;  %vm604_vm15 = vweird.f32 %v916_v22 }
 0x226   : > { %v596_v28 = vsel %vm593_vm14, %v595_v23, %v591_v25  ;;  %917 = vrcp.f32 %v528_v27  ;;  %vm605_vm1 = vmor %vm603_vm0, %vm604_vm15  ;;  %v624_v45 = vand.u32 2147483648, %v528_v27  ;;  %v622_v44 = vand.u32 2147483647, %v528_v27 }
 0x227   : > { %v597_v56 = vmul.f32 %v1122_v61, %v596_v28  ;;  %v600_v29 = vsub.f32 1.0, %v599_v26  ;;  %vm618_vm5 = vweird.f32 %v528_v27 }
 0x228   : > { %v625_v50 = vor.u32 1.1754944e-38, %v624_v45  ;;  %vm623_vm7 = vcmp.eq.f32.partialorder %v622_v44, 8.507059e+37 }
 0x229   : > { %750 = vst.msk [vmem:[%s1180_s19 + $0x10] sm:$0xff] %vm435_vm2, %v597_v56  ;;  %v601_v31 = vmul.f32 %v916_v22, %v600_v29 }
 0x22b   : > { %v602_v32 = vadd.f32 %v916_v22, %v601_v31 }
 0x22c   : > { %v918_v36 = vpop.eup %917 }
 0x22d   : > { %v606_v39 = vsel %vm605_vm1, %v916_v22, %v602_v32  ;;  %v614_v38 = vmul.f32 %v918_v36, %v528_v27  ;;  %vm619_vm4 = vweird.f32 %v918_v36 }
 0x22e   : > { %v611_v41 = vsel %vm608_vm3, %v610_v37, %v606_v39  ;;  %vm620_vm6 = vmor %vm618_vm5, %vm619_vm4 }
 0x22f   : > { %v612_v43 = vmul.f32 %v1127_v2, %v611_v41  ;;  %v615_v61 = vsub.f32 1.0, %v614_v38 }
 0x231   : > { %751 = vst.msk [vmem:[%s1180_s19 + $0x18] sm:$0xff] %vm435_vm2, %v612_v43  ;;  %v616_v47 = vmul.f32 %v918_v36, %v615_v61 }
 0x233   : > { %v617_v48 = vadd.f32 %v918_v36, %v616_v47  ;;  %v531_v49 = vpop.xlane.xlu0 %530 }
 0x234   : > { %919 = vrcp.f32 %v531_v49  ;;  %v639_v59 = vand.u32 2147483648, %v531_v49  ;;  %v637_v62 = vand.u32 2147483647, %v531_v49  ;;  %vm633_vm9 = vweird.f32 %v531_v49 }
 0x235   : > { %v621_v52 = vsel %vm620_vm6, %v918_v36, %v617_v48 }
 0x236   : > { %v626_v53 = vsel %vm623_vm7, %v625_v50, %v621_v52  ;;  %v640_v1 = vor.u32 1.1754944e-38, %v639_v59  ;;  %vm638_vm11 = vcmp.eq.f32.partialorder %v637_v62, 8.507059e+37 }
 0x237   : > { %v627_v54 = vmul.f32 %v1131_v5, %v626_v53 }
 0x239   : > { %752 = vst.msk [vmem:[%s1180_s19 + $0x20] sm:$0xff] %vm435_vm2, %v627_v54 }
 0x23a   : > { %v920_v2 = vpop.eup %919 }
 0x23b   : > { %v629_v55 = vmul.f32 %v920_v2, %v531_v49  ;;  %v534_v57 = vpop.xlane.xlu1 %533  ;;  %vm634_vm8 = vweird.f32 %v920_v2 }
 0x23c   : > { %921 = vrcp.f32 %v534_v57  ;;  %vm635_vm10 = vmor %vm633_vm9, %vm634_vm8  ;;  %v654_v9 = vand.u32 2147483648, %v534_v57  ;;  %v652_v11 = vand.u32 2147483647, %v534_v57  ;;  %vm648_vm13 = vweird.f32 %v534_v57 }
 0x23d   : > { %v630_v58 = vsub.f32 1.0, %v629_v55 }
 0x23e   : > { %v655_v15 = vor.u32 1.1754944e-38, %v654_v9  ;;  %vm653_vm15 = vcmp.eq.f32.partialorder %v652_v11, 8.507059e+37 }
 0x23f   : > { %v631_v60 = vmul.f32 %v920_v2, %v630_v58 }
 0x241   : > { %v632_v63 = vadd.f32 %v920_v2, %v631_v60 }
 0x242   : > { %v922_v0 = vpop.eup %921 }
 0x243   : > { %v636_v3 = vsel %vm635_vm10, %v920_v2, %v632_v63  ;;  %v644_v5 = vmul.f32 %v922_v0, %v534_v57  ;;  %v537_v4 = vpop.xlane.xlu2 %536  ;;  %vm649_vm12 = vweird.f32 %v922_v0 }
 0x244   : > { %v641_v6 = vsel %vm638_vm11, %v640_v1, %v636_v3  ;;  %923 = vrcp.f32 %v537_v4  ;;  %vm650_vm14 = vmor %vm648_vm13, %vm649_vm12  ;;  %v669_v22 = vand.u32 2147483648, %v537_v4  ;;  %v667_v25 = vand.u32 2147483647, %v537_v4 }
 0x245   : > { %v642_v7 = vmul.f32 %v1137_v12, %v641_v6  ;;  %v645_v8 = vsub.f32 1.0, %v644_v5  ;;  %vm663_vm1 = vweird.f32 %v537_v4 }
 0x246   : > { %v670_v28 = vor.u32 1.1754944e-38, %v669_v22  ;;  %vm668_vm4 = vcmp.eq.f32.partialorder %v667_v25, 8.507059e+37 }
 0x247   : > { %753 = vst.msk [vmem:[%s1180_s19 + $0x28] sm:$0xff] %vm435_vm2, %v642_v7  ;;  %v646_v10 = vmul.f32 %v922_v0, %v645_v8 }
 0x249   : > { %v647_v13 = vadd.f32 %v922_v0, %v646_v10 }
 0x24a   : > { %v924_v14 = vpop.eup %923 }
 0x24b   : > { %v651_v51 = vsel %vm650_vm14, %v922_v0, %v647_v13  ;;  %v659_v16 = vmul.f32 %v924_v14, %v537_v4  ;;  %v540_v18 = vpop.xlane.xlu0 %539  ;;  %vm664_vm0 = vweird.f32 %v924_v14 }
 0x24c   : > { %v656_v19 = vsel %vm653_vm15, %v655_v15, %v651_v51  ;;  %v546_v20 = vpop.xlane.xlu2 %545  ;;  %925 = vrcp.f32 %v540_v18  ;;  %vm665_vm3 = vmor %vm663_vm1, %vm664_vm0  ;;  %v684_v38 = vand.u32 2147483648, %v540_v18  ;;  %v682_v61 = vand.u32 2147483647, %v540_v18 }
 0x24d   : > { %v657_v12 = vmul.f32 %v1142_v17, %v656_v19  ;;  %v660_v21 = vsub.f32 1.0, %v659_v16  ;;  %927 = vrcp.f32 %v546_v20  ;;  %v714_v41 = vand.u32 2147483648, %v546_v20 }
 0x24e   : > { %v712_v47 = vand.u32 2147483647, %v546_v20  ;;  %vm678_vm7 = vweird.f32 %v540_v18  ;;  %vm708_vm8 = vweird.f32 %v546_v20  ;;  %vm683_vm11 = vcmp.eq.f32.partialorder %v682_v61, 8.507059e+37 }
 0x24f   : > { %754 = vst.msk [vmem:[%s1180_s19 + $0x30] sm:$0xff] %vm435_vm2, %v657_v12  ;;  %v661_v23 = vmul.f32 %v924_v14, %v660_v21  ;;  %v715_v52 = vor.u32 1.1754944e-38, %v714_v41 }
 0x250   : > { %vm713_vm12 = vcmp.eq.f32.partialorder %v712_v47, 8.507059e+37 }
 0x251   : > { %v662_v26 = vadd.f32 %v924_v14, %v661_v23 }
 0x252   : > { %v926_v27 = vpop.eup %925 }
 0x253   : > { %v928_v56 = vpop.eup %927  ;;  %v666_v29 = vsel %vm665_vm3, %v924_v14, %v662_v26  ;;  %v674_v30 = vmul.f32 %v926_v27, %v540_v18  ;;  %v1203_v31 = vpop.xlane.xlu0 %548  ;;  %vm679_vm5 = vweird.f32 %v926_v27 }
 0x254   : > { %v671_v17 = vsel %vm668_vm4, %v670_v28, %v666_v29  ;;  %v704_v34 = vmul.f32 %v928_v56, %v546_v20  ;;  %v543_v32 = vpop.xlane.xlu1 %542  ;;  %929 = vrcp.f32 %v1203_v31  ;;  %vm709_vm6 = vweird.f32 %v928_v56  ;;  %vm680_vm9 = vmor %vm678_vm7, %vm679_vm5 }
 0x255   : > { %v672_v36 = vmul.f32 %v1148_v24, %v671_v17  ;;  %v675_v37 = vsub.f32 1.0, %v674_v30  ;;  %931 = vrcp.f32 %v543_v32  ;;  %v685_v24 = vor.u32 1.1754944e-38, %v684_v38  ;;  %vm710_vm10 = vmor %vm708_vm8, %vm709_vm6 }
 0x256   : > { %v705_v39 = vsub.f32 1.0, %v704_v34  ;;  %v729_v1 = vand.u32 2147483648, %v1203_v31  ;;  %v699_v3 = vand.u32 2147483648, %v543_v32  ;;  %v727_v4 = vand.u32 2147483647, %v1203_v31 }
 0x257   : > { %755 = vst.msk [vmem:[%s1180_s19 + $0x38] sm:$0xff] %vm435_vm2, %v672_v36  ;;  %v676_v43 = vmul.f32 %v926_v27, %v675_v37  ;;  %v697_v7 = vand.u32 2147483647, %v543_v32  ;;  %vm723_vm15 = vweird.f32 %v1203_v31  ;;  %vm693_vm0 = vweird.f32 %v543_v32 }
 0x258   : > { %v706_v45 = vmul.f32 %v928_v56, %v705_v39  ;;  %v700_v10 = vor.u32 1.1754944e-38, %v699_v3  ;;  %vm728_vm4 = vcmp.eq.f32.partialorder %v727_v4, 8.507059e+37 }
 0x259   : > { %v677_v44 = vadd.f32 %v926_v27, %v676_v43  ;;  %vm698_vm5 = vcmp.eq.f32.partialorder %v697_v7, 8.507059e+37 }
 0x25a   : > { %v930_v48 = vpop.eup %929  ;;  %v707_v49 = vadd.f32 %v928_v56, %v706_v45 }
 0x25b   : > { %v932_v50 = vpop.eup %931  ;;  %v681_v53 = vsel %vm680_vm9, %v926_v27, %v677_v44  ;;  %v719_v54 = vmul.f32 %v930_v48, %v1203_v31  ;;  %vm724_vm13 = vweird.f32 %v930_v48 }
 0x25c   : > { %v711_v2 = vsel %vm710_vm10, %v928_v56, %v707_v49  ;;  %v686_v55 = vsel %vm683_vm11, %v685_v24, %v681_v53  ;;  %v689_v57 = vmul.f32 %v932_v50, %v543_v32  ;;  %v552_v58 = vpop.xlane.xlu1 %551  ;;  %vm694_vm14 = vweird.f32 %v932_v50  ;;  %vm725_vm1 = vmor %vm723_vm15, %vm724_vm13 }
 0x25d   : > { %v716_v59 = vsel %vm713_vm12, %v715_v52, %v711_v2  ;;  %v687_v60 = vmul.f32 %v1154_v33, %v686_v55  ;;  %v720_v62 = vsub.f32 1.0, %v719_v54  ;;  %933 = vrcp.f32 %v552_v58  ;;  %vm695_vm3 = vmor %vm693_vm0, %vm694_vm14 }
 0x25e   : > { %v717_v63 = vmul.f32 %v1156_v35, %v716_v59  ;;  %v690_v0 = vsub.f32 1.0, %v689_v57  ;;  %v730_v35 = vor.u32 1.1754944e-38, %v729_v1  ;;  %v744_v20 = vand.u32 2147483648, %v552_v58 }
 0x25f   : > { %756 = vst.msk [vmem:[%s1180_s19 + $0x40] sm:$0xff] %vm435_vm2, %v687_v60  ;;  %v721_v5 = vmul.f32 %v930_v48, %v720_v62  ;;  %v742_v21 = vand.u32 2147483647, %v552_v58  ;;  %vm738_vm7 = vweird.f32 %v552_v58 }
 0x260   : > { %758 = vst.msk [vmem:[%s1180_s19 + $0x50] sm:$0xff] %vm435_vm2, %v717_v63  ;;  %v691_v6 = vmul.f32 %v932_v50, %v690_v0  ;;  %v745_v23 = vor.u32 1.1754944e-38, %v744_v20 }
 0x261   : > { %v722_v33 = vadd.f32 %v930_v48, %v721_v5  ;;  %vm743_vm9 = vcmp.eq.f32.partialorder %v742_v21, 8.507059e+37 }
 0x262   : > { %v692_v8 = vadd.f32 %v932_v50, %v691_v6 }
 0x263   : > { %v934_v9 = vpop.eup %933  ;;  %v726_v11 = vsel %vm725_vm1, %v930_v48, %v722_v33 }
 0x264   : > { %v696_v13 = vsel %vm695_vm3, %v932_v50, %v692_v8  ;;  %v731_v14 = vsel %vm728_vm4, %v730_v35, %v726_v11  ;;  %v734_v15 = vmul.f32 %v934_v9, %v552_v58  ;;  %vm739_vm6 = vweird.f32 %v934_v9 }
 0x265   : > { %v701_v51 = vsel %vm698_vm5, %v700_v10, %v696_v13  ;;  %v732_v16 = vmul.f32 %v1163_v40, %v731_v14  ;;  %vm740_vm8 = vmor %vm738_vm7, %vm739_vm6 }
 0x266   : > { %v702_v18 = vmul.f32 %v1165_v42, %v701_v51  ;;  %v735_v19 = vsub.f32 1.0, %v734_v15 }
 0x267   : > { %759 = vst.msk [vmem:[%s1180_s19 + $0x58] sm:$0xff] %vm435_vm2, %v732_v16 }
 0x268   : > { %757 = vst.msk [vmem:[%s1180_s19 + $0x48] sm:$0xff] %vm435_vm2, %v702_v18  ;;  %v736_v12 = vmul.f32 %v934_v9, %v735_v19 }
 0x26a   : > { %v737_v22 = vadd.f32 %v934_v9, %v736_v12 }
 0x26c   : > { %v741_v25 = vsel %vm740_vm8, %v934_v9, %v737_v22 }
 0x26d   : > { %v746_v26 = vsel %vm743_vm9, %v745_v23, %v741_v25 }
 0x26e   : > { %v747_v40 = vmul.f32 %v1171_v46, %v746_v26 }
 0x270   : > { %760 = vst.msk [vmem:[%s1180_s19 + $0x60] sm:$0xff] %vm435_vm2, %v747_v40 }
 0x271 PF: > { %s15_s18 = sadd.s32 1, %s941_s18  }
 0x272   : > { %p12_p4 = scmp.ge.s32.totalorder %s15_s18, 4  }
 0x274   :  { %14 = sbr.rel (!%p12_p4) target bundleno = 1 (0x1), region = 70 }

</bundles_post_ra>
